<compile_context>
chip_gen: v7x
topology: tpu7x:2x2x1
jax: 0.10.0
libtpu: 0.0.40
codegen_flags: <defaults>
</compile_context>

<pallas_src>
import jax
import jax.numpy as jnp
import numpy as np
from jax.experimental import pallas as pl
from jax.experimental.pallas import tpu as pltpu

_LANE = 128


# ----------------------------------------------------------------------------
# GTConv: out[o, t] = sum_i w_soft[o, i] * A_flat[i, t]   (1 or 2 weight sets)
# ----------------------------------------------------------------------------
def _gtconv_call(A, w_softs, *, vmem_budget_bytes=12 * 1024 * 1024):
    """A: (C_in, H, W); w_softs: tuple of (C_out, C_in) softmaxed weights.

    Returns a tuple of (C_out, H, W) arrays, one per weight set, computed in a
    single pallas_call (A is read from HBM exactly once).
    """
    n_conv = len(w_softs)
    C_in, H, W = A.shape
    C_out = w_softs[0].shape[0]
    flat = H * W

    # Lane-dense flattened layout, padded to a multiple of 128.
    flat_pad = pl.cdiv(flat, _LANE) * _LANE

    # Tile the flattened axis; size from a double-buffered VMEM budget:
    #   2 * (C_in + n_conv*C_out) * tile * 4B  <=  budget
    bytes_per_col = 8 * (C_in + n_conv * C_out)
    tile = max(_LANE, (vmem_budget_bytes // bytes_per_col) // _LANE * _LANE)
    tile = min(tile, flat_pad)
    flat_pad = pl.cdiv(flat_pad, tile) * tile  # make grid exact

    A2 = A.reshape(C_in, flat)
    if flat_pad != flat:
        A2 = jnp.pad(A2, ((0, 0), (0, flat_pad - flat)))

    def kernel(*refs):
        w_refs = refs[:n_conv]
        a_ref = refs[n_conv]
        o_refs = refs[n_conv + 1:]
        a = a_ref[...].astype(jnp.float32)                     # (C_in, tile)
        for w_ref, o_ref in zip(w_refs, o_refs):
            # (C_out, C_in) @ (C_in, tile) -> (C_out, tile) on the MXU slot.
            o_ref[...] = jnp.dot(
                w_ref[...].astype(jnp.float32), a,
                preferred_element_type=jnp.float32).astype(o_ref.dtype)

    grid = (flat_pad // tile,)
    w_spec = pl.BlockSpec((C_out, C_in), lambda i: (0, 0))      # whole (tiny) weight
    out_flat = pl.pallas_call(
        kernel,
        out_shape=tuple(jax.ShapeDtypeStruct((C_out, flat_pad), A.dtype)
                        for _ in range(n_conv)),
        grid_spec=pltpu.PrefetchScalarGridSpec(
            num_scalar_prefetch=0,
            grid=grid,
            in_specs=[w_spec] * n_conv
                     + [pl.BlockSpec((C_in, tile), lambda i: (0, i))],
            out_specs=[pl.BlockSpec((C_out, tile), lambda i: (0, i))] * n_conv,
        ),
        compiler_params=pltpu.CompilerParams(
            dimension_semantics=("parallel",),
            vmem_limit_bytes=32 * 1024 * 1024),
    )(*w_softs, A2)

    return tuple(o[:, :flat].reshape(C_out, H, W) for o in out_flat)


# ----------------------------------------------------------------------------
# Batched matmul: H[c] = a[c] @ b[c]
# ----------------------------------------------------------------------------
def _pick_tile(n):
    for t in (512, 256, 128):
        if n % t == 0:
            return t
    return n  # full extent (allowed even when not (8,128)-divisible)


def _bmm_kernel(a_ref, b_ref, o_ref, acc_ref):
    @pl.when(pl.program_id(3) == 0)
    def _():
        acc_ref[...] = jnp.zeros_like(acc_ref)

    acc_ref[...] += jnp.einsum(
        'bmk,bkn->bmn', a_ref[...], b_ref[...],
        preferred_element_type=jnp.float32)

    @pl.when(pl.program_id(3) == pl.num_programs(3) - 1)
    def _():
        o_ref[...] = acc_ref[...].astype(o_ref.dtype)


def batched_matmul(a, b):
    """a: (C, M, K), b: (C, K, N) -> (C, M, N)."""
    C, M, K = a.shape
    _, _, N = b.shape
    tm, tn, tk = _pick_tile(M), _pick_tile(N), _pick_tile(K)
    grid = (C, M // tm, N // tn, K // tk)
    return pl.pallas_call(
        _bmm_kernel,
        out_shape=jax.ShapeDtypeStruct((C, M, N), a.dtype),
        grid_spec=pltpu.PrefetchScalarGridSpec(
            num_scalar_prefetch=0,
            grid=grid,
            in_specs=[
                pl.BlockSpec((1, tm, tk), lambda c, i, j, k: (c, i, k)),
                pl.BlockSpec((1, tk, tn), lambda c, i, j, k: (c, k, j)),
            ],
            out_specs=pl.BlockSpec((1, tm, tn), lambda c, i, j, k: (c, i, j)),
            scratch_shapes=[pltpu.VMEM((1, tm, tn), jnp.float32)],
        ),
        compiler_params=pltpu.CompilerParams(
            dimension_semantics=("parallel", "parallel", "parallel", "arbitrary"),
            vmem_limit_bytes=32 * 1024 * 1024),
    )(a, b)


# ----------------------------------------------------------------------------
# GTLayer forward
# ----------------------------------------------------------------------------
def gtlayer_forward(A, weight1, weight2=None, H_=None, first=True):
    """A: (C_in, N, N); weight*: (C_out, C_in, 1, 1). Returns (H, [W...])."""
    C_out, C_in = weight1.shape[0], weight1.shape[1]
    w1_soft = jax.nn.softmax(weight1.reshape(C_out, C_in), axis=1)

    if first:
        w2_soft = jax.nn.softmax(weight2.reshape(C_out, C_in), axis=1)
        a, b = _gtconv_call(A, (w1_soft, w2_soft))   # one pass over A for both convs
        H = batched_matmul(a, b)
        Ws = [w1_soft.reshape(C_out, C_in, 1, 1), w2_soft.reshape(C_out, C_in, 1, 1)]
    else:
        (a,) = _gtconv_call(A, (w1_soft,))
        H = batched_matmul(H_, a)
        Ws = [w1_soft.reshape(C_out, C_in, 1, 1)]
    return H, Ws


# ----------------------------------------------------------------------------
# Self-test
# ----------------------------------------------------------------------------
def _reference(A, w1, w2):
    C_out, C_in = w1.shape[0], w1.shape[1]
    w1s = jax.nn.softmax(w1.reshape(C_out, C_in), axis=1)
    w2s = jax.nn.softmax(w2.reshape(C_out, C_in), axis=1)
    a = jnp.einsum('oi,ihw->ohw', w1s, A)
    b = jnp.einsum('oi,ihw->ohw', w2s, A)
    return jnp.einsum('omk,okn->omn', a, b)


if __name__ == "__main__":
    key = jax.random.PRNGKey(0)
    k_a, k_w1, k_w2 = jax.random.split(key, 3)

    in_channels, out_channels, N = 4, 2, 16

    # Module-faithful init (reset_parameters: constant 0.1; scale fixed, unused).
    w1 = jnp.full((out_channels, in_channels, 1, 1), 0.1, dtype=jnp.float32)
    w2 = jnp.full((out_channels, in_channels, 1, 1), 0.1, dtype=jnp.float32)
    A = jax.random.uniform(k_a, (in_channels, N, N), dtype=jnp.float32)

    H, Ws = gtlayer_forward(A, w1, w2, first=True)
    H = jax.block_until_ready(H)
    np.testing.assert_allclose(np.asarray(H), np.asarray(_reference(A, w1, w2)),
                               rtol=1e-5, atol=1e-5)

    # Second check with non-degenerate (random) weights to exercise distinct
    # softmax rows and the a != b bmm path.
    w1r = 0.1 * jax.random.normal(k_w1, (out_channels, in_channels, 1, 1), jnp.float32)
    w2r = 0.1 * jax.random.normal(k_w2, (out_channels, in_channels, 1, 1), jnp.float32)
    Hr, _ = gtlayer_forward(A, w1r, w2r, first=True)
    Hr = jax.block_until_ready(Hr)
    np.testing.assert_allclose(np.asarray(Hr), np.asarray(_reference(A, w1r, w2r)),
                               rtol=1e-5, atol=1e-5)

    print("KERNEL_OK")
</pallas_src>

<mosaic_0001>
module attributes {stable_mosaic.version = 11 : i64} {
  func.func @kernel(%arg0: i32, %arg1: memref<2x4xf32, #tpu.memory_space<vmem>>, %arg2: memref<2x4xf32, #tpu.memory_space<vmem>>, %arg3: memref<4x256xf32, #tpu.memory_space<vmem>>, %arg4: memref<2x256xf32, #tpu.memory_space<vmem>>, %arg5: memref<2x256xf32, #tpu.memory_space<vmem>>) attributes {dimension_semantics = [#tpu.dimension_semantics<parallel>], iteration_bounds = array<i64: 1>, scalar_prefetch = 0 : i64, scratch_operands = 0 : i64, tpu.core_type = #tpu.core_type<tc>, window_params = [{pipeline_mode = #tpu.pipeline_mode<synchronous>, transform_indices = @transform_0, window_bounds = array<i64: 2, 4>}, {pipeline_mode = #tpu.pipeline_mode<synchronous>, transform_indices = @transform_1, window_bounds = array<i64: 2, 4>}, {transform_indices = @transform_2, window_bounds = array<i64: 4, 256>}, {transform_indices = @transform_3, window_bounds = array<i64: 2, 256>}, {transform_indices = @transform_4, window_bounds = array<i64: 2, 256>}]} {
    %c0 = arith.constant 0 : index
    %c0_0 = arith.constant 0 : index
    %0 = vector.load %arg3[%c0, %c0_0] : memref<4x256xf32, #tpu.memory_space<vmem>>, vector<4x256xf32>
    %c0_1 = arith.constant 0 : index
    %c0_2 = arith.constant 0 : index
    %1 = vector.load %arg1[%c0_1, %c0_2] : memref<2x4xf32, #tpu.memory_space<vmem>>, vector<2x4xf32>
    %cst = arith.constant dense<0.000000e+00> : vector<2x256xf32>
    %2 = tpu.matmul %1, %0, %cst {dimension_numbers = #tpu.dot_dimension_numbers<[1], [0], [0], [1], [0, 0, 1, 1], [], []>} : vector<2x4xf32>, vector<4x256xf32>, vector<2x256xf32> -> vector<2x256xf32>
    %c0_3 = arith.constant 0 : index
    %c0_4 = arith.constant 0 : index
    %3 = vector.load %arg4[%c0_3, %c0_4] : memref<2x256xf32, #tpu.memory_space<vmem>>, vector<2x256xf32>
    tpu.vector_store %arg4[%c0_3, %c0_4], %2 {strides = array<i32>} : memref<2x256xf32, #tpu.memory_space<vmem>>, vector<2x256xf32>,
    %c0_5 = arith.constant 0 : index
    %c0_6 = arith.constant 0 : index
    %4 = vector.load %arg2[%c0_5, %c0_6] : memref<2x4xf32, #tpu.memory_space<vmem>>, vector<2x4xf32>
    %cst_7 = arith.constant dense<0.000000e+00> : vector<2x256xf32>
    %5 = tpu.matmul %4, %0, %cst_7 {dimension_numbers = #tpu.dot_dimension_numbers<[1], [0], [0], [1], [0, 0, 1, 1], [], []>} : vector<2x4xf32>, vector<4x256xf32>, vector<2x256xf32> -> vector<2x256xf32>
    %c0_8 = arith.constant 0 : index
    %c0_9 = arith.constant 0 : index
    %6 = vector.load %arg5[%c0_8, %c0_9] : memref<2x256xf32, #tpu.memory_space<vmem>>, vector<2x256xf32>
    tpu.vector_store %arg5[%c0_8, %c0_9], %5 {strides = array<i32>} : memref<2x256xf32, #tpu.memory_space<vmem>>, vector<2x256xf32>,
    return
  }
  func.func @transform_0(%arg0: i32) -> (i32, i32) {
    %c0_i32 = arith.constant 0 : i32
    %c0_i32_0 = arith.constant 0 : i32
    %c0_i32_1 = arith.constant 0 : i32
    return %c0_i32, %c0_i32_0 : i32, i32
  }
  func.func @transform_1(%arg0: i32) -> (i32, i32) {
    %c0_i32 = arith.constant 0 : i32
    %c0_i32_0 = arith.constant 0 : i32
    %c0_i32_1 = arith.constant 0 : i32
    return %c0_i32, %c0_i32_0 : i32, i32
  }
  func.func @transform_2(%arg0: i32) -> (i32, i32) {
    %c0_i32 = arith.constant 0 : i32
    %c0_i32_0 = arith.constant 0 : i32
    return %c0_i32, %arg0 : i32, i32
  }
  func.func @transform_3(%arg0: i32) -> (i32, i32) {
    %c0_i32 = arith.constant 0 : i32
    %c0_i32_0 = arith.constant 0 : i32
    return %c0_i32, %arg0 : i32, i32
  }
  func.func @transform_4(%arg0: i32) -> (i32, i32) {
    %c0_i32 = arith.constant 0 : i32
    %c0_i32_0 = arith.constant 0 : i32
    return %c0_i32, %arg0 : i32, i32
  }
}

</mosaic_0001>

<bundles_post_ra>
// kernel: tpu_custom_call.1
= control target key start
LH: loop header
LB: loop body
LE: loop exit
PB: predicated region body
PF: predicated region fallthrough
CT: control target
= control target key end

     0   :  { %10 = vsyncpa [#allocation3], 0  ;;  %s446_s0 = inlined_call_operand.hbm [shape: f32[2,4], index: 0, kind: input, shape index: {}]   ;;  %s447_s1 = inlined_call_operand.vmem [shape: f32[2,4], index: 1, kind: input, shape index: {}]   ;;  %s448_s2 = inlined_call_operand.hbm [shape: f32[4,256], index: 2, kind: input, shape index: {}]   ;;  %s449_s3 = inlined_call_operand.hbm [shape: f32[2,256], index: 3, kind: output, shape index: {0}]   ;;  %s450_s4 = inlined_call_operand.hbm [shape: f32[2,256], index: 4, kind: output, shape index: {1}]  }
   0x1   :  { %11 = vsyncpa [#allocation6], 0 }
   0x2   :  { %12 = vsyncpa [#allocation4], 0 }
   0x3   :  { %13 = vsyncpa [#allocation9], 0  ;;  %s365_s15 = smov [#allocation2]   ;;  %s366_s17 = smov [#allocation5]  }
   0x4   :  { %s20_s16 = sshll.u32 %s365_s15, 4  ;;  %s32_s18 = sshll.u32 %s366_s17, 4  ;;  %s21_s16 = int_to_ptr.vmem [resolvable:$true] %s20_s16  ;;  %s33_s18 = int_to_ptr.vmem [resolvable:$true] %s32_s18 }
   0x5   :  { %s269_s21 = scalar_lea.hbm %s446_s0, 32 }
   0x6   :  { %p270_p0 = scmp.ne.s32.totalorder %s446_s0, %s269_s21  ;;  %p273_p1 = scmp.lt.u32.totalorder %s269_s21, %s446_s0 }
   0x8   :  { %p275_p2 = pnand %p273_p1, %p270_p0 }
   0xa   :  { %278 = shalt.err (!%p275_p2)
}
   0xb   :  { %s279_s26 = scalar_lea.vmem %s21_s16, 32  ;;  %p284_p4 = scmp.lt.s32.totalorder %s21_s16, %s21_s16 }
   0xc   :  { %p280_p3 = scmp.ne.s32.totalorder %s21_s16, %s279_s26  ;;  %p285_p5 = scmp.lt.s32.totalorder %s279_s26, %s279_s26 }
   0xe   :  { %p286_p6 = por %p285_p5, %p284_p4 }
  0x10   :  { %p287_p7 = pnand %p286_p6, %p280_p3 }
  0x12   :  { %290 = shalt.err (!%p287_p7)
}
  0x13   :  { %23 = dma.hbm_to_vmem [thread:$0]  %s446_s0, 32, %s21_s16, [#allocation3]  }
  0x14   :  { %s291_s5 = scalar_lea.hbm %s448_s2, 128 }
  0x15   :  { %p292_p8 = scmp.ne.s32.totalorder %s448_s2, %s291_s5  ;;  %p295_p9 = scmp.lt.u32.totalorder %s291_s5, %s448_s2 }
  0x17   :  { %p297_p10 = pnand %p295_p9, %p292_p8 }
  0x19   :  { %300 = shalt.err (!%p297_p10)
}
  0x1a   :  { %s301_s10 = scalar_lea.vmem %s33_s18, 128  ;;  %p306_p12 = scmp.lt.s32.totalorder %s33_s18, %s33_s18 }
  0x1b   :  { %p302_p11 = scmp.ne.s32.totalorder %s33_s18, %s301_s10  ;;  %p307_p13 = scmp.lt.s32.totalorder %s301_s10, %s301_s10 }
  0x1d   :  { %p308_p0 = por %p307_p13, %p306_p12 }
  0x1f   :  { %p309_p1 = pnand %p308_p0, %p302_p11 }
  0x21   :  { %312 = shalt.err (!%p309_p1)
}
  0x22   :  { %35 = dma.hbm_to_vmem [thread:$0]  %s448_s2, 128, %s33_s18, [#allocation6]  }
  0x23   :  { %357 = dma.done.wait [#allocation3], 32  }
  0x24   :  { %358 = vsyncadd [#allocation3], 4294967264 }
  0x25   :  { %359 = dma.done.wait [#allocation6], 128  }
  0x26   :  { %360 = vsyncadd [#allocation6], 4294967168  ;;  %v367_v0 = vmov 0.0   ;;  %v42_v1 = vld [vmem:[#allocation5] sm:$0xff]  ;;  %vm50_vm0 = vcmask 1043456   ;;  %vm46_vm1 = vcmask 31744  }
  0x27   :  { %119 = vmatprep.mubr.f32.mxu0 %v367_v0  ;;  %206 = vmatprep.mubr.f32.mxu1 %v367_v0  ;;  %v45_v2 = vcombine.high %v42_v1, %v42_v1  ;;  %v43_v3 = vld [vmem:[#allocation2] sm:$0x3]  ;;  %s368_s2 = smov [#allocation7]   ;;  %s369_s15 = smov [#allocation8]  }
  0x28   :  { %v138_v4 = vld [vmem:[%s447_s1] sm:$0x3]  ;;  %s231_s14 = sshll.u32 %s368_s2, 4  ;;  %s241_s16 = sshll.u32 %s369_s15, 4  ;;  %s232_s14 = int_to_ptr.vmem [resolvable:$true] %s231_s14  ;;  %s242_s16 = int_to_ptr.vmem [resolvable:$true] %s241_s16 }
  0x29   :  { %255 = vmatprep.subr.msk.mxu0 %vm50_vm0, %v45_v2  ;;  %259 = vmatprep.subr.msk.mxu1 %vm50_vm0, %v45_v2  ;;  %s313_s1 = scalar_lea.vmem %s232_s14, 64  ;;  %p318_p3 = scmp.lt.s32.totalorder %s232_s14, %s232_s14 }
  0x2a   :  { %256 = vmatpush1.msk.msra.mxu0 %vm50_vm0, %v42_v1  ;;  %260 = vmatpush1.msk.msra.mxu1 %vm50_vm0, %v42_v1  ;;  %p314_p2 = scmp.ne.s32.totalorder %s232_s14, %s313_s1  ;;  %p319_p4 = scmp.lt.s32.totalorder %s313_s1, %s313_s1 }
  0x2b   :  { %257 = vmatmul.mubr.msk.f32.vlgmr.msra.gmra.mrb[0].mxu0 %vm46_vm1, %v43_v3  ;;  %261 = vmatmul.mubr.msk.f32.vlgmr.msra.gmra.mrb[0].mxu1 %vm46_vm1, %v138_v4 }
  0x2c   :  { %p320_p5 = por %p319_p4, %p318_p3 }
  0x2e   :  { %p321_p6 = pnand %p320_p5, %p314_p2 }
  0xfe   :  { %v121_v5 = vpop.f32.mrb[0].mxu0  ;;  %v208_v6 = vpop.f32.mrb[0].mxu1 }
  0xff   :  { %v123_v7 = vpop.f32.mrb[1].mxu0  ;;  %v210_v8 = vpop.f32.mrb[1].mxu1 }
 0x100   :  { %v128_v9 = vcombine.low %v121_v5, %v123_v7  ;;  %v215_v10 = vcombine.low %v208_v6, %v210_v8 }
 0x102   :  { %258 = vst.sshfl [vmem:[#allocation7] sm:$0x33 pattern:$0x76325410] %v128_v9 }
 0x103   :  { %262 = vst.sshfl [vmem:[#allocation8] sm:$0x33 pattern:$0x76325410] %v215_v10 }
 0x104   :  { %324 = shalt.err (!%p321_p6)
}
 0x105   :  { %s325_s19 = scalar_lea.hbm %s449_s3, 64 }
 0x106   :  { %p326_p7 = scmp.ne.s32.totalorder %s449_s3, %s325_s19  ;;  %p329_p8 = scmp.lt.u32.totalorder %s325_s19, %s449_s3 }
 0x108   :  { %p331_p9 = pnand %p329_p8, %p326_p7 }
 0x10a   :  { %334 = shalt.err (!%p331_p9)
}
 0x10b   :  { %234 = dma.vmem_to_hbm [thread:$0]  %s232_s14, 64, %s449_s3, [#allocation4]  }
 0x10c   :  { %s335_s26 = scalar_lea.vmem %s242_s16, 64  ;;  %p340_p11 = scmp.lt.s32.totalorder %s242_s16, %s242_s16 }
 0x10d   :  { %p336_p10 = scmp.ne.s32.totalorder %s242_s16, %s335_s26  ;;  %p341_p12 = scmp.lt.s32.totalorder %s335_s26, %s335_s26 }
 0x10f   :  { %p342_p13 = por %p341_p12, %p340_p11 }
 0x111   :  { %p343_p0 = pnand %p342_p13, %p336_p10 }
 0x113   :  { %346 = shalt.err (!%p343_p0)
}
 0x114   :  { %s347_s29 = scalar_lea.hbm %s450_s4, 64 }
 0x115   :  { %p348_p1 = scmp.ne.s32.totalorder %s450_s4, %s347_s29  ;;  %p351_p2 = scmp.lt.u32.totalorder %s347_s29, %s450_s4 }
 0x117   :  { %p353_p3 = pnand %p351_p2, %p348_p1 }
 0x119   :  { %356 = shalt.err (!%p353_p3)
}
 0x11a   :  { %244 = dma.vmem_to_hbm [thread:$0]  %s242_s16, 64, %s450_s4, [#allocation9]  }
 0x11b   :  { %361 = dma.done.wait [#allocation4], 64  }
 0x11c   :  { %362 = vsyncadd [#allocation4], 4294967232 }
 0x11d   :  { %363 = dma.done.wait [#allocation9], 64  }
 0x11e   :  { %364 = vsyncadd [#allocation9], 4294967232 }
 0x11f   :  { %251 = vsyncpa [#allocation3], 1 }
 0x120   :  { %252 = vsyncpa [#allocation6], 1 }
 0x121   :  { %253 = vsyncpa [#allocation4], 1 }
 0x122   :  { %254 = vsyncpa [#allocation9], 1 }

</bundles_post_ra>
